<compile_context>
chip_gen: v6e
topology: v6e:2x2x1
jax: 0.10.0
libtpu: 0.0.40
codegen_flags: <defaults>
</compile_context>

<pallas_src>
import jax
import jax.numpy as jnp
from jax.experimental import pallas as pl
from jax.experimental.pallas import tpu as pltpu


def _add_conv1x1_kernel(a_ref, b_ref, w_ref, o_ref):
    # a_ref, b_ref: (Cin, M)   w_ref: (Cout_blk, Cin)   o_ref: (Cout_blk, M)
    x = a_ref[...] + b_ref[...]                        # fused residual add (VPU)
    o_ref[...] = jnp.dot(                              # 1x1 conv == matmul (MXU)
        w_ref[...], x, preferred_element_type=jnp.float32
    ).astype(o_ref.dtype)


def add_conv1x1(x335, x320, weight, *, cout_block=528):
    """x335, x320: (1, Cin, H, W) float32.  weight: (Cout, Cin, 1, 1) float32."""
    N, Cin, H, W = x335.shape
    Cout = weight.shape[0]
    # NCHW-native fast path relies on batch == 1 (as in the reference module)
    # so that NCHW -> (Cin, H*W) is a pure reshape.
    assert N == 1
    M = N * H * W

    # Free reshapes (no data movement):
    #   NCHW -> (Cin, M);   (Cout, Cin, 1, 1) -> (Cout, Cin)
    a = x335.reshape(Cin, M)
    b = x320.reshape(Cin, M)
    w = weight.reshape(Cout, Cin)

    assert Cout % cout_block == 0 and cout_block % 8 == 0
    grid = (Cout // cout_block,)

    flops = 2 * M * Cin * Cout
    bytes_accessed = 4 * (2 * Cin * M + Cout * Cin + Cout * M)

    out = pl.pallas_call(
        _add_conv1x1_kernel,
        out_shape=jax.ShapeDtypeStruct((Cout, M), jnp.float32),
        grid_spec=pltpu.PrefetchScalarGridSpec(
            num_scalar_prefetch=0,
            grid=grid,
            in_specs=[
                # Activations stay resident: block index is constant across the
                # grid so Pallas fetches them only once per core.
                pl.BlockSpec((Cin, M), lambda j: (0, 0)),
                pl.BlockSpec((Cin, M), lambda j: (0, 0)),
                # Weight tiled over Cout so its DMA overlaps the matmul and the
                # grid axis can shard across both TensorCores on v7x.
                pl.BlockSpec((cout_block, Cin), lambda j: (j, 0)),
            ],
            out_specs=pl.BlockSpec((cout_block, M), lambda j: (j, 0)),
        ),
        compiler_params=pltpu.CompilerParams(
            dimension_semantics=("parallel",),
        ),
        cost_estimate=pl.CostEstimate(
            flops=flops, transcendentals=0, bytes_accessed=bytes_accessed
        ),
    )(a, b, w)

    # (Cout, M) is already in NCHW element order for N == 1: free reshape.
    return out.reshape(N, Cout, H, W)


if __name__ == "__main__":
    key = jax.random.PRNGKey(0)
    k1, k2, k3 = jax.random.split(key, 3)

    N, Cin, H, W, Cout = 1, 176, 14, 14, 1056

    x335 = jax.random.normal(k1, (N, Cin, H, W), dtype=jnp.float32)
    x320 = jax.random.normal(k2, (N, Cin, H, W), dtype=jnp.float32)
    # Deterministic kaiming-uniform-like init for Conv2d(176, 1056, 1, bias=False)
    fan_in = Cin * 1 * 1
    bound = 1.0 / (fan_in ** 0.5)
    weight = jax.random.uniform(
        k3, (Cout, Cin, 1, 1), dtype=jnp.float32, minval=-bound, maxval=bound
    )

    y = add_conv1x1(x335, x320, weight)
    jax.block_until_ready(y)

    # sanity check against plain-JAX reference
    ref = jnp.einsum(
        "nchw,oc->nohw", x335 + x320, weight.reshape(Cout, Cin)
    )
    assert y.shape == (N, Cout, H, W)
    assert jnp.allclose(y, ref, atol=1e-4, rtol=1e-4)

    print("KERNEL_OK")
</pallas_src>

<mosaic_0001>
module attributes {stable_mosaic.version = 11 : i64} {
  func.func @_add_conv1x1_kernel(%arg0: i32, %arg1: memref<176x196xf32, #tpu.memory_space<vmem>>, %arg2: memref<176x196xf32, #tpu.memory_space<vmem>>, %arg3: memref<528x176xf32, #tpu.memory_space<vmem>>, %arg4: memref<528x196xf32, #tpu.memory_space<vmem>>) attributes {dimension_semantics = [#tpu.dimension_semantics<parallel>], iteration_bounds = array<i64: 2>, scalar_prefetch = 0 : i64, scratch_operands = 0 : i64, tpu.core_type = #tpu.core_type<tc>, window_params = [{pipeline_mode = #tpu.pipeline_mode<synchronous>, transform_indices = @transform_0, window_bounds = array<i64: 176, 196>}, {pipeline_mode = #tpu.pipeline_mode<synchronous>, transform_indices = @transform_1, window_bounds = array<i64: 176, 196>}, {transform_indices = @transform_2, window_bounds = array<i64: 528, 176>}, {transform_indices = @transform_3, window_bounds = array<i64: 528, 196>}]} {
    %c0 = arith.constant 0 : index
    %c0_0 = arith.constant 0 : index
    %0 = vector.load %arg1[%c0, %c0_0] : memref<176x196xf32, #tpu.memory_space<vmem>>, vector<176x196xf32>
    %c0_1 = arith.constant 0 : index
    %c0_2 = arith.constant 0 : index
    %1 = vector.load %arg2[%c0_1, %c0_2] : memref<176x196xf32, #tpu.memory_space<vmem>>, vector<176x196xf32>
    %2 = arith.addf %0, %1 : vector<176x196xf32>
    %c0_3 = arith.constant 0 : index
    %c0_4 = arith.constant 0 : index
    %3 = vector.load %arg3[%c0_3, %c0_4] : memref<528x176xf32, #tpu.memory_space<vmem>>, vector<528x176xf32>
    %cst = arith.constant dense<0.000000e+00> : vector<528x196xf32>
    %4 = tpu.matmul %3, %2, %cst {dimension_numbers = #tpu.dot_dimension_numbers<[1], [0], [0], [1], [0, 0, 1, 1], [], []>} : vector<528x176xf32>, vector<176x196xf32>, vector<528x196xf32> -> vector<528x196xf32>
    %c0_5 = arith.constant 0 : index
    %c0_6 = arith.constant 0 : index
    %5 = vector.load %arg4[%c0_5, %c0_6] : memref<528x196xf32, #tpu.memory_space<vmem>>, vector<528x196xf32>
    tpu.vector_store %arg4[%c0_5, %c0_6], %4 {strides = array<i32>} : memref<528x196xf32, #tpu.memory_space<vmem>>, vector<528x196xf32>,
    return
  }
  func.func @transform_0(%arg0: i32) -> (i32, i32) {
    %c0_i32 = arith.constant 0 : i32
    %c0_i32_0 = arith.constant 0 : i32
    %c0_i32_1 = arith.constant 0 : i32
    return %c0_i32, %c0_i32_0 : i32, i32
  }
  func.func @transform_1(%arg0: i32) -> (i32, i32) {
    %c0_i32 = arith.constant 0 : i32
    %c0_i32_0 = arith.constant 0 : i32
    %c0_i32_1 = arith.constant 0 : i32
    return %c0_i32, %c0_i32_0 : i32, i32
  }
  func.func @transform_2(%arg0: i32) -> (i32, i32) {
    %c0_i32 = arith.constant 0 : i32
    %c0_i32_0 = arith.constant 0 : i32
    return %arg0, %c0_i32 : i32, i32
  }
  func.func @transform_3(%arg0: i32) -> (i32, i32) {
    %c0_i32 = arith.constant 0 : i32
    %c0_i32_0 = arith.constant 0 : i32
    return %arg0, %c0_i32 : i32, i32
  }
}

</mosaic_0001>

<bundles_post_ra>
// kernel: tpu_custom_call.1
= control target key start
LH: loop header
LB: loop body
LE: loop exit
PB: predicated region body
PF: predicated region fallthrough
CT: control target
= control target key end

     0   :  { %s1453_s12 = smov 0   ;;  %s2149_s0 = inlined_call_operand.vmem [shape: f32[176,196], index: 0, kind: input, shape index: {}]   ;;  %s2150_s1 = inlined_call_operand.vmem [shape: f32[176,196], index: 1, kind: input, shape index: {}]   ;;  %s2151_s2 = inlined_call_operand.vmem [shape: f32[1056,176], index: 2, kind: input, shape index: {}]   ;;  %s2152_s3 = inlined_call_operand.vmem [shape: f32[1056,196], index: 3, kind: output, shape index: {}]  }
   0x1 LB: > { %s1294_s13 = sadd.s32 4294967295, %s1431_s12   ;;  %p1298_p0 = scmp.ge.s32.totalorder %s1431_s12, 1  ;;  %s1431_s12 = sphi %s1453_s12, %s13_s12  }
   0x2   : > { %p139_p1 = scmp.lt.s32.totalorder %s1431_s12, 3 }
   0x4   : > { %p140_p2 = pnand %p1298_p0, %p139_p1 }
   0x5   : > { %s1649_s11 = smul.u32 (!%p140_p2), 66, %s1294_s13 }
   0x6   : > { %143 = sbr.rel (%p140_p2) target bundleno = 384 (0x180), region = 32 }
   0x7   : > { %p166_p3 = scmp.lt.s32.totalorder (!%p140_p2), %s1649_s11, 131 }
   0xb   : > { %v210_v0 = vld [vmem:[%s2149_s0 + $0xf8] sm:$0xff]  ;;  %v209_v2 = vld [vmem:[%s2149_s0 + $0xf0] sm:$0xff]  ;;  %v208_v5 = vld [vmem:[%s2149_s0 + $0xe8] sm:$0xff]  ;;  %s2154_s11 = smov (!%p166_p3, %s1649_s11), 131  ;;  %vm443_vm0 = vcmask 392192   ;;  %vm1104_vm1 = vcmask 556032  }
   0xc   : > { %v254_v1 = vld [vmem:[%s2150_s1 + $0xf8] sm:$0xff]  ;;  %v253_v4 = vld [vmem:[%s2150_s1 + $0xf0] sm:$0xff]  ;;  %v252_v6 = vld [vmem:[%s2150_s1 + $0xe8] sm:$0xff]  ;;  %s1371_s9 = sshll.u32 %s2154_s11, 4 }
   0xd   : > { %v298_v3 = vadd.f32 %v254_v1, %v210_v0  ;;  %v297_v7 = vadd.f32 %v253_v4, %v209_v2  ;;  %v296_v8 = vadd.f32 %v252_v6, %v208_v5  ;;  %v207_v9 = vld [vmem:[%s2149_s0 + $0xe0] sm:$0xff]  ;;  %v206_v11 = vld [vmem:[%s2149_s0 + $0xd8] sm:$0xff]  ;;  %v205_v14 = vld [vmem:[%s2149_s0 + $0xd0] sm:$0xff]  ;;  %s1741_s19 = scalar_lea.vmem %s2151_s2, %s1371_s9  ;;  %s1946_s21 = scalar_lea.vmem %s2152_s3, %s1371_s9 }
   0xe   : > { %v251_v10 = vld [vmem:[%s2150_s1 + $0xe0] sm:$0xff]  ;;  %v250_v13 = vld [vmem:[%s2150_s1 + $0xd8] sm:$0xff]  ;;  %v249_v15 = vld [vmem:[%s2150_s1 + $0xd0] sm:$0xff] }
   0xf   : > { %642 = vmatprep.subr.mxu0 %v298_v3  ;;  %1373 = vmatprep.subr.mxu1 %v298_v3  ;;  %v295_v12 = vadd.f32 %v251_v10, %v207_v9  ;;  %v294_v16 = vadd.f32 %v250_v13, %v206_v11  ;;  %v293_v17 = vadd.f32 %v249_v15, %v205_v14  ;;  %v204_v18 = vld [vmem:[%s2149_s0 + $0xc8] sm:$0xff]  ;;  %v203_v20 = vld [vmem:[%s2149_s0 + $0xc0] sm:$0xff]  ;;  %v202_v23 = vld [vmem:[%s2149_s0 + $0xb8] sm:$0xff] }
  0x10   : > { %643 = vmatpush1.msra.mxu0 %v297_v7  ;;  %1395 = vmatpush1.msra.mxu1 %v297_v7  ;;  %v248_v19 = vld [vmem:[%s2150_s1 + $0xc8] sm:$0xff]  ;;  %v247_v22 = vld [vmem:[%s2150_s1 + $0xc0] sm:$0xff]  ;;  %v246_v24 = vld [vmem:[%s2150_s1 + $0xb8] sm:$0xff] }
  0x11   : > { %644 = vmatprep.subr.mxu0 %v296_v8  ;;  %1374 = vmatprep.subr.mxu1 %v296_v8  ;;  %v292_v21 = vadd.f32 %v248_v19, %v204_v18  ;;  %v291_v25 = vadd.f32 %v247_v22, %v203_v20  ;;  %v201_v26 = vld [vmem:[%s2149_s0 + $0xb0] sm:$0xff]  ;;  %v200_v28 = vld [vmem:[%s2149_s0 + $0xa8] sm:$0xff]  ;;  %v290_v29 = vadd.f32 %v246_v24, %v202_v23  ;;  %v199_v31 = vld [vmem:[%s2149_s0 + $0xa0] sm:$0xff] }
  0x12   : > { %645 = vmatpush1.msra.mxu0 %v295_v12  ;;  %1396 = vmatpush1.msra.mxu1 %v295_v12  ;;  %v245_v27 = vld [vmem:[%s2150_s1 + $0xb0] sm:$0xff]  ;;  %v244_v30 = vld [vmem:[%s2150_s1 + $0xa8] sm:$0xff]  ;;  %v243_v32 = vld [vmem:[%s2150_s1 + $0xa0] sm:$0xff] }
  0x13   : > { %646 = vmatprep.subr.mxu0 %v294_v16  ;;  %1375 = vmatprep.subr.mxu1 %v294_v16  ;;  %v289_v33 = vadd.f32 %v245_v27, %v201_v26  ;;  %v198_v34 = vld [vmem:[%s2149_s0 + $0x98] sm:$0xff]  ;;  %v288_v36 = vadd.f32 %v244_v30, %v200_v28  ;;  %v197_v37 = vld [vmem:[%s2149_s0 + $0x90] sm:$0xff]  ;;  %v287_v39 = vadd.f32 %v243_v32, %v199_v31  ;;  %v196_v40 = vld [vmem:[%s2149_s0 + $0x88] sm:$0xff] }
  0x14   : > { %647 = vmatpush1.msra.mxu0 %v293_v17  ;;  %1397 = vmatpush1.msra.mxu1 %v293_v17  ;;  %v242_v35 = vld [vmem:[%s2150_s1 + $0x98] sm:$0xff]  ;;  %v241_v38 = vld [vmem:[%s2150_s1 + $0x90] sm:$0xff]  ;;  %v240_v41 = vld [vmem:[%s2150_s1 + $0x88] sm:$0xff] }
  0x15   : > { %648 = vmatprep.subr.mxu0 %v292_v21  ;;  %1376 = vmatprep.subr.mxu1 %v292_v21  ;;  %v286_v42 = vadd.f32 %v242_v35, %v198_v34  ;;  %v195_v43 = vld [vmem:[%s2149_s0 + $0x80] sm:$0xff]  ;;  %v285_v45 = vadd.f32 %v241_v38, %v197_v37  ;;  %v194_v46 = vld [vmem:[%s2149_s0 + $0x78] sm:$0xff]  ;;  %v284_v48 = vadd.f32 %v240_v41, %v196_v40  ;;  %v193_v49 = vld [vmem:[%s2149_s0 + $0x70] sm:$0xff] }
  0x16   : > { %649 = vmatpush1.msra.mxu0 %v291_v25  ;;  %1398 = vmatpush1.msra.mxu1 %v291_v25  ;;  %v239_v44 = vld [vmem:[%s2150_s1 + $0x80] sm:$0xff]  ;;  %v238_v47 = vld [vmem:[%s2150_s1 + $0x78] sm:$0xff]  ;;  %v237_v50 = vld [vmem:[%s2150_s1 + $0x70] sm:$0xff] }
  0x17   : > { %650 = vmatprep.subr.mxu0 %v290_v29  ;;  %1377 = vmatprep.subr.mxu1 %v290_v29  ;;  %v283_v51 = vadd.f32 %v239_v44, %v195_v43  ;;  %v192_v52 = vld [vmem:[%s2149_s0 + $0x68] sm:$0xff]  ;;  %v282_v54 = vadd.f32 %v238_v47, %v194_v46  ;;  %v191_v55 = vld [vmem:[%s2149_s0 + $0x60] sm:$0xff]  ;;  %v281_v57 = vadd.f32 %v237_v50, %v193_v49  ;;  %v190_v58 = vld [vmem:[%s2149_s0 + $0x58] sm:$0xff] }
  0x18   : > { %651 = vmatpush1.msra.mxu0 %v289_v33  ;;  %1399 = vmatpush1.msra.mxu1 %v289_v33  ;;  %v236_v53 = vld [vmem:[%s2150_s1 + $0x68] sm:$0xff]  ;;  %v235_v56 = vld [vmem:[%s2150_s1 + $0x60] sm:$0xff]  ;;  %v234_v59 = vld [vmem:[%s2150_s1 + $0x58] sm:$0xff] }
  0x19   : > { %652 = vmatprep.subr.mxu0 %v288_v36  ;;  %1378 = vmatprep.subr.mxu1 %v288_v36  ;;  %v280_v60 = vadd.f32 %v236_v53, %v192_v52  ;;  %v189_v61 = vld [vmem:[%s2149_s0 + $0x50] sm:$0xff]  ;;  %v279_v63 = vadd.f32 %v235_v56, %v191_v55  ;;  %v188_v0 = vld [vmem:[%s2149_s0 + $0x48] sm:$0xff]  ;;  %v278_v2 = vadd.f32 %v234_v59, %v190_v58  ;;  %v187_v3 = vld [vmem:[%s2149_s0 + $0x40] sm:$0xff] }
  0x1a   : > { %653 = vmatpush1.msra.mxu0 %v287_v39  ;;  %1400 = vmatpush1.msra.mxu1 %v287_v39  ;;  %v233_v62 = vld [vmem:[%s2150_s1 + $0x50] sm:$0xff]  ;;  %v232_v1 = vld [vmem:[%s2150_s1 + $0x48] sm:$0xff]  ;;  %v231_v4 = vld [vmem:[%s2150_s1 + $0x40] sm:$0xff] }
  0x1b   : > { %654 = vmatprep.subr.mxu0 %v286_v42  ;;  %1379 = vmatprep.subr.mxu1 %v286_v42  ;;  %v277_v5 = vadd.f32 %v233_v62, %v189_v61  ;;  %v186_v6 = vld [vmem:[%s2149_s0 + $0x38] sm:$0xff]  ;;  %v276_v8 = vadd.f32 %v232_v1, %v188_v0  ;;  %v185_v9 = vld [vmem:[%s2149_s0 + $0x30] sm:$0xff]  ;;  %v275_v11 = vadd.f32 %v231_v4, %v187_v3  ;;  %v184_v12 = vld [vmem:[%s2149_s0 + $0x28] sm:$0xff] }
  0x1c   : > { %655 = vmatpush1.msra.mxu0 %v285_v45  ;;  %1401 = vmatpush1.msra.mxu1 %v285_v45  ;;  %v230_v7 = vld [vmem:[%s2150_s1 + $0x38] sm:$0xff]  ;;  %v229_v10 = vld [vmem:[%s2150_s1 + $0x30] sm:$0xff]  ;;  %v228_v13 = vld [vmem:[%s2150_s1 + $0x28] sm:$0xff] }
  0x1d   : > { %656 = vmatprep.subr.mxu0 %v284_v48  ;;  %1380 = vmatprep.subr.mxu1 %v284_v48  ;;  %v274_v14 = vadd.f32 %v230_v7, %v186_v6  ;;  %v183_v15 = vld [vmem:[%s2149_s0 + $0x20] sm:$0xff]  ;;  %v273_v17 = vadd.f32 %v229_v10, %v185_v9  ;;  %v182_v18 = vld [vmem:[%s2149_s0 + $0x18] sm:$0xff]  ;;  %v272_v20 = vadd.f32 %v228_v13, %v184_v12  ;;  %v181_v21 = vld [vmem:[%s2149_s0 + $0x10] sm:$0xff] }
  0x1e   : > { %657 = vmatpush1.msra.mxu0 %v283_v51  ;;  %1402 = vmatpush1.msra.mxu1 %v283_v51  ;;  %v227_v16 = vld [vmem:[%s2150_s1 + $0x20] sm:$0xff]  ;;  %v226_v19 = vld [vmem:[%s2150_s1 + $0x18] sm:$0xff]  ;;  %v225_v22 = vld [vmem:[%s2150_s1 + $0x10] sm:$0xff] }
  0x1f   : > { %658 = vmatprep.subr.mxu0 %v282_v54  ;;  %1381 = vmatprep.subr.mxu1 %v282_v54  ;;  %v271_v23 = vadd.f32 %v227_v16, %v183_v15  ;;  %v180_v24 = vld [vmem:[%s2149_s0 + $0x8] sm:$0xff]  ;;  %v270_v26 = vadd.f32 %v226_v19, %v182_v18  ;;  %v179_v27 = vld [vmem:[%s2149_s0] sm:$0xff]  ;;  %v269_v29 = vadd.f32 %v225_v22, %v181_v21  ;;  %v222_v30 = vld [vmem:[%s2149_s0 + $0x158] sm:$0xff] }
  0x20   : > { %659 = vmatpush1.msra.mxu0 %v281_v57  ;;  %1403 = vmatpush1.msra.mxu1 %v281_v57  ;;  %v224_v25 = vld [vmem:[%s2150_s1 + $0x8] sm:$0xff]  ;;  %v223_v28 = vld [vmem:[%s2150_s1] sm:$0xff]  ;;  %v266_v31 = vld [vmem:[%s2150_s1 + $0x158] sm:$0xff] }
  0x21   : > { %660 = vmatprep.subr.mxu0 %v280_v60  ;;  %1382 = vmatprep.subr.mxu1 %v280_v60  ;;  %v268_v32 = vadd.f32 %v224_v25, %v180_v24  ;;  %v221_v33 = vld [vmem:[%s2149_s0 + $0x150] sm:$0xff]  ;;  %v267_v35 = vadd.f32 %v223_v28, %v179_v27  ;;  %v220_v36 = vld [vmem:[%s2149_s0 + $0x148] sm:$0xff]  ;;  %v310_v38 = vadd.f32 %v266_v31, %v222_v30  ;;  %v219_v39 = vld [vmem:[%s2149_s0 + $0x140] sm:$0xff] }
  0x22   : > { %661 = vmatpush1.msra.mxu0 %v279_v63  ;;  %1404 = vmatpush1.msra.mxu1 %v279_v63  ;;  %v265_v34 = vld [vmem:[%s2150_s1 + $0x150] sm:$0xff]  ;;  %v264_v37 = vld [vmem:[%s2150_s1 + $0x148] sm:$0xff]  ;;  %v263_v40 = vld [vmem:[%s2150_s1 + $0x140] sm:$0xff] }
  0x23   : > { %662 = vmatprep.subr.mxu0 %v278_v2  ;;  %1383 = vmatprep.subr.mxu1 %v278_v2  ;;  %v309_v41 = vadd.f32 %v265_v34, %v221_v33  ;;  %v218_v42 = vld [vmem:[%s2149_s0 + $0x138] sm:$0xff]  ;;  %v308_v44 = vadd.f32 %v264_v37, %v220_v36  ;;  %v217_v45 = vld [vmem:[%s2149_s0 + $0x130] sm:$0xff]  ;;  %v307_v47 = vadd.f32 %v263_v40, %v219_v39  ;;  %v216_v48 = vld [vmem:[%s2149_s0 + $0x128] sm:$0xff] }
  0x24   : > { %663 = vmatpush1.msra.mxu0 %v277_v5  ;;  %1405 = vmatpush1.msra.mxu1 %v277_v5  ;;  %v262_v43 = vld [vmem:[%s2150_s1 + $0x138] sm:$0xff]  ;;  %v261_v46 = vld [vmem:[%s2150_s1 + $0x130] sm:$0xff]  ;;  %v260_v49 = vld [vmem:[%s2150_s1 + $0x128] sm:$0xff] }
  0x25   : > { %664 = vmatprep.subr.mxu0 %v276_v8  ;;  %1384 = vmatprep.subr.mxu1 %v276_v8  ;;  %v306_v50 = vadd.f32 %v262_v43, %v218_v42  ;;  %v215_v51 = vld [vmem:[%s2149_s0 + $0x120] sm:$0xff]  ;;  %v305_v53 = vadd.f32 %v261_v46, %v217_v45  ;;  %v214_v54 = vld [vmem:[%s2149_s0 + $0x118] sm:$0xff]  ;;  %v304_v56 = vadd.f32 %v260_v49, %v216_v48  ;;  %v213_v57 = vld [vmem:[%s2149_s0 + $0x110] sm:$0xff] }
  0x26   : > { %665 = vmatpush1.msra.mxu0 %v275_v11  ;;  %1406 = vmatpush1.msra.mxu1 %v275_v11  ;;  %v259_v52 = vld [vmem:[%s2150_s1 + $0x120] sm:$0xff]  ;;  %v258_v55 = vld [vmem:[%s2150_s1 + $0x118] sm:$0xff]  ;;  %v257_v58 = vld [vmem:[%s2150_s1 + $0x110] sm:$0xff] }
  0x27   : > { %666 = vmatprep.subr.mxu0 %v274_v14  ;;  %1385 = vmatprep.subr.mxu1 %v274_v14  ;;  %v303_v59 = vadd.f32 %v259_v52, %v215_v51  ;;  %v212_v60 = vld [vmem:[%s2149_s0 + $0x108] sm:$0xff]  ;;  %v302_v62 = vadd.f32 %v258_v55, %v214_v54  ;;  %v211_v63 = vld [vmem:[%s2149_s0 + $0x100] sm:$0xff]  ;;  %v301_v1 = vadd.f32 %v257_v58, %v213_v57  ;;  %v378_v5 = vld [vmem:[%s1741_s19 + $0x218] sm:$0xff] }
  0x28   : > { %667 = vmatpush1.msra.mxu0 %v273_v17  ;;  %1407 = vmatpush1.msra.mxu1 %v273_v17  ;;  %v256_v61 = vld [vmem:[%s2150_s1 + $0x108] sm:$0xff]  ;;  %v255_v0 = vld [vmem:[%s2150_s1 + $0x100] sm:$0xff]  ;;  %v377_v7 = vld [vmem:[%s1741_s19 + $0x210] sm:$0xff] }
  0x29   : > { %668 = vmatprep.subr.mxu0 %v272_v20  ;;  %1386 = vmatprep.subr.mxu1 %v272_v20  ;;  %v300_v2 = vadd.f32 %v256_v61, %v212_v60  ;;  %v299_v3 = vadd.f32 %v255_v0, %v211_v63  ;;  %v312_v4 = vld [vmem:[%s1741_s19 + $0x8] sm:$0xff]  ;;  %v311_v6 = vld [vmem:[%s1741_s19] sm:$0xff]  ;;  %v314_v8 = vld [vmem:[%s1741_s19 + $0x18] sm:$0xff] }
  0x2a   : > { %669 = vmatpush1.msra.mxu0 %v271_v23  ;;  %1408 = vmatpush1.msra.mxu1 %v271_v23  ;;  %v380_v9 = vld [vmem:[%s1741_s19 + $0x228] sm:$0xff]  ;;  %v313_v10 = vld [vmem:[%s1741_s19 + $0x10] sm:$0xff]  ;;  %v379_v11 = vld [vmem:[%s1741_s19 + $0x220] sm:$0xff] }
  0x2b   : > { %670 = vmatprep.subr.mxu0 %v270_v26  ;;  %1387 = vmatprep.subr.mxu1 %v270_v26  ;;  %v316_v12 = vld [vmem:[%s1741_s19 + $0x28] sm:$0xff]  ;;  %v382_v13 = vld [vmem:[%s1741_s19 + $0x238] sm:$0xff]  ;;  %v315_v14 = vld [vmem:[%s1741_s19 + $0x20] sm:$0xff] }
  0x2c   : > { %671 = vmatpush1.msra.mxu0 %v269_v29  ;;  %1409 = vmatpush1.msra.mxu1 %v269_v29  ;;  %v381_v15 = vld [vmem:[%s1741_s19 + $0x230] sm:$0xff]  ;;  %v318_v16 = vld [vmem:[%s1741_s19 + $0x38] sm:$0xff]  ;;  %v384_v17 = vld [vmem:[%s1741_s19 + $0x248] sm:$0xff] }
  0x2d   : > { %672 = vmatprep.subr.mxu0 %v268_v32  ;;  %1388 = vmatprep.subr.mxu1 %v268_v32  ;;  %v317_v18 = vld [vmem:[%s1741_s19 + $0x30] sm:$0xff]  ;;  %v383_v19 = vld [vmem:[%s1741_s19 + $0x240] sm:$0xff]  ;;  %v320_v20 = vld [vmem:[%s1741_s19 + $0x48] sm:$0xff] }
  0x2e   : > { %673 = vmatpush1.msra.mxu0 %v267_v35  ;;  %1410 = vmatpush1.msra.mxu1 %v267_v35  ;;  %v386_v21 = vld [vmem:[%s1741_s19 + $0x258] sm:$0xff]  ;;  %v319_v22 = vld [vmem:[%s1741_s19 + $0x40] sm:$0xff]  ;;  %v385_v23 = vld [vmem:[%s1741_s19 + $0x250] sm:$0xff] }
  0x2f   : > { %694 = vmatprep.subr.mxu0 %v310_v38  ;;  %1389 = vmatprep.subr.mxu1 %v310_v38  ;;  %v322_v24 = vld [vmem:[%s1741_s19 + $0x58] sm:$0xff]  ;;  %v388_v25 = vld [vmem:[%s1741_s19 + $0x268] sm:$0xff]  ;;  %v321_v26 = vld [vmem:[%s1741_s19 + $0x50] sm:$0xff] }
  0x30   : > { %695 = vmatpush2.msra.mxu0 %v309_v41  ;;  %1411 = vmatpush2.msra.mxu1 %v309_v41  ;;  %v387_v27 = vld [vmem:[%s1741_s19 + $0x260] sm:$0xff]  ;;  %v324_v28 = vld [vmem:[%s1741_s19 + $0x68] sm:$0xff]  ;;  %v390_v29 = vld [vmem:[%s1741_s19 + $0x278] sm:$0xff] }
  0x31   : > { %696 = vmatprep.subr.mxu0 %v308_v44  ;;  %1390 = vmatprep.subr.mxu1 %v308_v44  ;;  %v323_v30 = vld [vmem:[%s1741_s19 + $0x60] sm:$0xff]  ;;  %v389_v31 = vld [vmem:[%s1741_s19 + $0x270] sm:$0xff]  ;;  %v326_v32 = vld [vmem:[%s1741_s19 + $0x78] sm:$0xff] }
  0x32   : > { %697 = vmatpush2.msra.mxu0 %v307_v47  ;;  %1412 = vmatpush2.msra.mxu1 %v307_v47  ;;  %v392_v33 = vld [vmem:[%s1741_s19 + $0x288] sm:$0xff]  ;;  %v325_v34 = vld [vmem:[%s1741_s19 + $0x70] sm:$0xff]  ;;  %v391_v35 = vld [vmem:[%s1741_s19 + $0x280] sm:$0xff] }
  0x33   : > { %698 = vmatprep.subr.mxu0 %v306_v50  ;;  %1391 = vmatprep.subr.mxu1 %v306_v50  ;;  %v328_v36 = vld [vmem:[%s1741_s19 + $0x88] sm:$0xff]  ;;  %v394_v37 = vld [vmem:[%s1741_s19 + $0x298] sm:$0xff]  ;;  %v327_v38 = vld [vmem:[%s1741_s19 + $0x80] sm:$0xff] }
  0x34   : > { %699 = vmatpush2.msra.mxu0 %v305_v53  ;;  %1413 = vmatpush2.msra.mxu1 %v305_v53  ;;  %v393_v39 = vld [vmem:[%s1741_s19 + $0x290] sm:$0xff]  ;;  %v330_v40 = vld [vmem:[%s1741_s19 + $0x98] sm:$0xff]  ;;  %v396_v41 = vld [vmem:[%s1741_s19 + $0x2a8] sm:$0xff] }
  0x35   : > { %700 = vmatprep.subr.mxu0 %v304_v56  ;;  %1392 = vmatprep.subr.mxu1 %v304_v56  ;;  %v329_v42 = vld [vmem:[%s1741_s19 + $0x90] sm:$0xff]  ;;  %v395_v43 = vld [vmem:[%s1741_s19 + $0x2a0] sm:$0xff]  ;;  %v332_v44 = vld [vmem:[%s1741_s19 + $0xa8] sm:$0xff] }
  0x36   : > { %701 = vmatpush2.msra.mxu0 %v303_v59  ;;  %1414 = vmatpush2.msra.mxu1 %v303_v59  ;;  %v398_v45 = vld [vmem:[%s1741_s19 + $0x2b8] sm:$0xff]  ;;  %v331_v46 = vld [vmem:[%s1741_s19 + $0xa0] sm:$0xff]  ;;  %v397_v47 = vld [vmem:[%s1741_s19 + $0x2b0] sm:$0xff] }
  0x37   : > { %702 = vmatprep.subr.mxu0 %v302_v62  ;;  %1393 = vmatprep.subr.mxu1 %v302_v62  ;;  %v334_v48 = vld [vmem:[%s1741_s19 + $0xb8] sm:$0xff]  ;;  %v400_v49 = vld [vmem:[%s1741_s19 + $0x2c8] sm:$0xff]  ;;  %v333_v50 = vld [vmem:[%s1741_s19 + $0xb0] sm:$0xff] }
  0x38   : > { %703 = vmatpush2.msra.mxu0 %v301_v1  ;;  %1415 = vmatpush2.msra.mxu1 %v301_v1  ;;  %v399_v51 = vld [vmem:[%s1741_s19 + $0x2c0] sm:$0xff]  ;;  %v336_v52 = vld [vmem:[%s1741_s19 + $0xc8] sm:$0xff]  ;;  %v402_v53 = vld [vmem:[%s1741_s19 + $0x2d8] sm:$0xff] }
  0x39   : > { %704 = vmatprep.subr.mxu0 %v300_v2  ;;  %1394 = vmatprep.subr.mxu1 %v300_v2  ;;  %v335_v54 = vld [vmem:[%s1741_s19 + $0xc0] sm:$0xff]  ;;  %v401_v55 = vld [vmem:[%s1741_s19 + $0x2d0] sm:$0xff]  ;;  %v338_v56 = vld [vmem:[%s1741_s19 + $0xd8] sm:$0xff] }
  0x3a   : > { %705 = vmatpush2.msra.mxu0 %v299_v3  ;;  %1416 = vmatpush2.msra.mxu1 %v299_v3  ;;  %v404_v57 = vld [vmem:[%s1741_s19 + $0x2e8] sm:$0xff]  ;;  %v337_v58 = vld [vmem:[%s1741_s19 + $0xd0] sm:$0xff]  ;;  %v403_v59 = vld [vmem:[%s1741_s19 + $0x2e0] sm:$0xff] }
  0x3b   : > { %1303 = vmatprep.mubr.msk.f32.mxu0 %vm443_vm0, %v312_v4  ;;  %1336 = vmatprep.mubr.msk.f32.mxu1 %vm443_vm0, %v378_v5  ;;  %v340_v60 = vld [vmem:[%s1741_s19 + $0xe8] sm:$0xff]  ;;  %v406_v61 = vld [vmem:[%s1741_s19 + $0x2f8] sm:$0xff]  ;;  %v339_v62 = vld [vmem:[%s1741_s19 + $0xe0] sm:$0xff] }
  0x3c   : > { %707 = vmatmul.mubr.f32.vlgmr.msra.gmra.mxu0 %v311_v6  ;;  %905 = vmatmul.mubr.f32.vlgmr.msra.gmra.mxu1 %v377_v7  ;;  %v405_v63 = vld [vmem:[%s1741_s19 + $0x2f0] sm:$0xff]  ;;  %v342_v0 = vld [vmem:[%s1741_s19 + $0xf8] sm:$0xff]  ;;  %v408_v1 = vld [vmem:[%s1741_s19 + $0x308] sm:$0xff] }
  0x3d   : > { %1304 = vmatprep.mubr.msk.f32.mxu0 %vm443_vm0, %v314_v8  ;;  %1337 = vmatprep.mubr.msk.f32.mxu1 %vm443_vm0, %v380_v9  ;;  %v341_v2 = vld [vmem:[%s1741_s19 + $0xf0] sm:$0xff]  ;;  %v407_v3 = vld [vmem:[%s1741_s19 + $0x300] sm:$0xff]  ;;  %v344_v4 = vld [vmem:[%s1741_s19 + $0x108] sm:$0xff] }
  0x3e   : > { %v410_v5 = vld [vmem:[%s1741_s19 + $0x318] sm:$0xff]  ;;  %v343_v6 = vld [vmem:[%s1741_s19 + $0x100] sm:$0xff]  ;;  %v409_v7 = vld [vmem:[%s1741_s19 + $0x310] sm:$0xff] }
  0x3f   : > { %v346_v8 = vld [vmem:[%s1741_s19 + $0x118] sm:$0xff]  ;;  %v412_v9 = vld [vmem:[%s1741_s19 + $0x328] sm:$0xff] }
  0x40   : > { %713 = vmatmul.mubr.f32.gmra.mxu0 %v313_v10  ;;  %911 = vmatmul.mubr.f32.gmra.mxu1 %v379_v11  ;;  %v345_v10 = vld [vmem:[%s1741_s19 + $0x110] sm:$0xff]  ;;  %v411_v11 = vld [vmem:[%s1741_s19 + $0x320] sm:$0xff] }
  0x41   : > { %1305 = vmatprep.mubr.msk.f32.mxu0 %vm443_vm0, %v316_v12  ;;  %1338 = vmatprep.mubr.msk.f32.mxu1 %vm443_vm0, %v382_v13  ;;  %v348_v12 = vld [vmem:[%s1741_s19 + $0x128] sm:$0xff]  ;;  %v414_v13 = vld [vmem:[%s1741_s19 + $0x338] sm:$0xff] }
  0x44   : > { %719 = vmatmul.mubr.f32.gmra.mxu0 %v315_v14  ;;  %917 = vmatmul.mubr.f32.gmra.mxu1 %v381_v15  ;;  %v347_v14 = vld [vmem:[%s1741_s19 + $0x120] sm:$0xff]  ;;  %v413_v15 = vld [vmem:[%s1741_s19 + $0x330] sm:$0xff] }
  0x45   : > { %1306 = vmatprep.mubr.msk.f32.mxu0 %vm443_vm0, %v318_v16  ;;  %1339 = vmatprep.mubr.msk.f32.mxu1 %vm443_vm0, %v384_v17  ;;  %v350_v16 = vld [vmem:[%s1741_s19 + $0x138] sm:$0xff]  ;;  %v416_v17 = vld [vmem:[%s1741_s19 + $0x348] sm:$0xff] }
  0x48   : > { %725 = vmatmul.mubr.f32.gmra.mxu0 %v317_v18  ;;  %923 = vmatmul.mubr.f32.gmra.mxu1 %v383_v19  ;;  %v349_v18 = vld [vmem:[%s1741_s19 + $0x130] sm:$0xff]  ;;  %v415_v19 = vld [vmem:[%s1741_s19 + $0x340] sm:$0xff] }
  0x49   : > { %1307 = vmatprep.mubr.msk.f32.mxu0 %vm443_vm0, %v320_v20  ;;  %1340 = vmatprep.mubr.msk.f32.mxu1 %vm443_vm0, %v386_v21  ;;  %v352_v20 = vld [vmem:[%s1741_s19 + $0x148] sm:$0xff]  ;;  %v418_v21 = vld [vmem:[%s1741_s19 + $0x358] sm:$0xff] }
  0x4c   : > { %731 = vmatmul.mubr.f32.gmra.mxu0 %v319_v22  ;;  %929 = vmatmul.mubr.f32.gmra.mxu1 %v385_v23  ;;  %v351_v22 = vld [vmem:[%s1741_s19 + $0x140] sm:$0xff]  ;;  %v417_v23 = vld [vmem:[%s1741_s19 + $0x350] sm:$0xff] }
  0x4d   : > { %1308 = vmatprep.mubr.msk.f32.mxu0 %vm443_vm0, %v322_v24  ;;  %1341 = vmatprep.mubr.msk.f32.mxu1 %vm443_vm0, %v388_v25  ;;  %v354_v24 = vld [vmem:[%s1741_s19 + $0x158] sm:$0xff]  ;;  %v420_v25 = vld [vmem:[%s1741_s19 + $0x368] sm:$0xff] }
  0x50   : > { %737 = vmatmul.mubr.f32.gmra.mxu0 %v321_v26  ;;  %935 = vmatmul.mubr.f32.gmra.mxu1 %v387_v27  ;;  %v353_v26 = vld [vmem:[%s1741_s19 + $0x150] sm:$0xff]  ;;  %v419_v27 = vld [vmem:[%s1741_s19 + $0x360] sm:$0xff] }
  0x51   : > { %1309 = vmatprep.mubr.msk.f32.mxu0 %vm443_vm0, %v324_v28  ;;  %1342 = vmatprep.mubr.msk.f32.mxu1 %vm443_vm0, %v390_v29  ;;  %v356_v28 = vld [vmem:[%s1741_s19 + $0x168] sm:$0xff]  ;;  %v422_v29 = vld [vmem:[%s1741_s19 + $0x378] sm:$0xff] }
  0x54   : > { %743 = vmatmul.mubr.f32.gmra.mxu0 %v323_v30  ;;  %941 = vmatmul.mubr.f32.gmra.mxu1 %v389_v31  ;;  %v355_v30 = vld [vmem:[%s1741_s19 + $0x160] sm:$0xff]  ;;  %v421_v31 = vld [vmem:[%s1741_s19 + $0x370] sm:$0xff] }
  0x55   : > { %1310 = vmatprep.mubr.msk.f32.mxu0 %vm443_vm0, %v326_v32  ;;  %1343 = vmatprep.mubr.msk.f32.mxu1 %vm443_vm0, %v392_v33  ;;  %v358_v32 = vld [vmem:[%s1741_s19 + $0x178] sm:$0xff]  ;;  %v424_v33 = vld [vmem:[%s1741_s19 + $0x388] sm:$0xff] }
  0x58   : > { %749 = vmatmul.mubr.f32.gmra.mxu0 %v325_v34  ;;  %947 = vmatmul.mubr.f32.gmra.mxu1 %v391_v35  ;;  %v357_v34 = vld [vmem:[%s1741_s19 + $0x170] sm:$0xff]  ;;  %v423_v35 = vld [vmem:[%s1741_s19 + $0x380] sm:$0xff] }
  0x59   : > { %1311 = vmatprep.mubr.msk.f32.mxu0 %vm443_vm0, %v328_v36  ;;  %1344 = vmatprep.mubr.msk.f32.mxu1 %vm443_vm0, %v394_v37  ;;  %v360_v36 = vld [vmem:[%s1741_s19 + $0x188] sm:$0xff]  ;;  %v426_v37 = vld [vmem:[%s1741_s19 + $0x398] sm:$0xff] }
  0x5c   : > { %755 = vmatmul.mubr.f32.gmra.mxu0 %v327_v38  ;;  %953 = vmatmul.mubr.f32.gmra.mxu1 %v393_v39  ;;  %v359_v38 = vld [vmem:[%s1741_s19 + $0x180] sm:$0xff]  ;;  %v425_v39 = vld [vmem:[%s1741_s19 + $0x390] sm:$0xff] }
  0x5d   : > { %1312 = vmatprep.mubr.msk.f32.mxu0 %vm443_vm0, %v330_v40  ;;  %1345 = vmatprep.mubr.msk.f32.mxu1 %vm443_vm0, %v396_v41  ;;  %v362_v40 = vld [vmem:[%s1741_s19 + $0x198] sm:$0xff]  ;;  %v428_v41 = vld [vmem:[%s1741_s19 + $0x3a8] sm:$0xff] }
  0x60   : > { %761 = vmatmul.mubr.f32.gmra.mxu0 %v329_v42  ;;  %959 = vmatmul.mubr.f32.gmra.mxu1 %v395_v43  ;;  %v361_v42 = vld [vmem:[%s1741_s19 + $0x190] sm:$0xff]  ;;  %v427_v43 = vld [vmem:[%s1741_s19 + $0x3a0] sm:$0xff] }
  0x61   : > { %1313 = vmatprep.mubr.msk.f32.mxu0 %vm443_vm0, %v332_v44  ;;  %1346 = vmatprep.mubr.msk.f32.mxu1 %vm443_vm0, %v398_v45  ;;  %v364_v44 = vld [vmem:[%s1741_s19 + $0x1a8] sm:$0xff]  ;;  %v430_v45 = vld [vmem:[%s1741_s19 + $0x3b8] sm:$0xff] }
  0x64   : > { %767 = vmatmul.mubr.f32.gmra.mxu0 %v331_v46  ;;  %965 = vmatmul.mubr.f32.gmra.mxu1 %v397_v47  ;;  %v363_v46 = vld [vmem:[%s1741_s19 + $0x1a0] sm:$0xff]  ;;  %v429_v47 = vld [vmem:[%s1741_s19 + $0x3b0] sm:$0xff] }
  0x65   : > { %1314 = vmatprep.mubr.msk.f32.mxu0 %vm443_vm0, %v334_v48  ;;  %1347 = vmatprep.mubr.msk.f32.mxu1 %vm443_vm0, %v400_v49  ;;  %v366_v48 = vld [vmem:[%s1741_s19 + $0x1b8] sm:$0xff]  ;;  %v432_v49 = vld [vmem:[%s1741_s19 + $0x3c8] sm:$0xff] }
  0x68   : > { %773 = vmatmul.mubr.f32.gmra.mxu0 %v333_v50  ;;  %971 = vmatmul.mubr.f32.gmra.mxu1 %v399_v51  ;;  %v365_v50 = vld [vmem:[%s1741_s19 + $0x1b0] sm:$0xff]  ;;  %v431_v51 = vld [vmem:[%s1741_s19 + $0x3c0] sm:$0xff] }
  0x69   : > { %1315 = vmatprep.mubr.msk.f32.mxu0 %vm443_vm0, %v336_v52  ;;  %1348 = vmatprep.mubr.msk.f32.mxu1 %vm443_vm0, %v402_v53  ;;  %v368_v52 = vld [vmem:[%s1741_s19 + $0x1c8] sm:$0xff]  ;;  %v434_v53 = vld [vmem:[%s1741_s19 + $0x3d8] sm:$0xff] }
  0x6c   : > { %779 = vmatmul.mubr.f32.gmra.mxu0 %v335_v54  ;;  %977 = vmatmul.mubr.f32.gmra.mxu1 %v401_v55  ;;  %v367_v54 = vld [vmem:[%s1741_s19 + $0x1c0] sm:$0xff]  ;;  %v433_v55 = vld [vmem:[%s1741_s19 + $0x3d0] sm:$0xff] }
  0x6d   : > { %1316 = vmatprep.mubr.msk.f32.mxu0 %vm443_vm0, %v338_v56  ;;  %1349 = vmatprep.mubr.msk.f32.mxu1 %vm443_vm0, %v404_v57  ;;  %v370_v56 = vld [vmem:[%s1741_s19 + $0x1d8] sm:$0xff]  ;;  %v436_v57 = vld [vmem:[%s1741_s19 + $0x3e8] sm:$0xff] }
  0x70   : > { %785 = vmatmul.mubr.f32.gmra.mxu0 %v337_v58  ;;  %983 = vmatmul.mubr.f32.gmra.mxu1 %v403_v59  ;;  %v369_v58 = vld [vmem:[%s1741_s19 + $0x1d0] sm:$0xff]  ;;  %v435_v59 = vld [vmem:[%s1741_s19 + $0x3e0] sm:$0xff] }
  0x71   : > { %1317 = vmatprep.mubr.msk.f32.mxu0 %vm443_vm0, %v340_v60  ;;  %1350 = vmatprep.mubr.msk.f32.mxu1 %vm443_vm0, %v406_v61  ;;  %v372_v60 = vld [vmem:[%s1741_s19 + $0x1e8] sm:$0xff]  ;;  %v438_v61 = vld [vmem:[%s1741_s19 + $0x3f8] sm:$0xff] }
  0x74   : > { %791 = vmatmul.mubr.f32.gmra.mxu0 %v339_v62  ;;  %989 = vmatmul.mubr.f32.gmra.mxu1 %v405_v63  ;;  %v371_v62 = vld [vmem:[%s1741_s19 + $0x1e0] sm:$0xff]  ;;  %v437_v63 = vld [vmem:[%s1741_s19 + $0x3f0] sm:$0xff] }
  0x75   : > { %1318 = vmatprep.mubr.msk.f32.mxu0 %vm443_vm0, %v342_v0  ;;  %1351 = vmatprep.mubr.msk.f32.mxu1 %vm443_vm0, %v408_v1  ;;  %v374_v0 = vld [vmem:[%s1741_s19 + $0x1f8] sm:$0xff]  ;;  %v440_v1 = vld [vmem:[%s1741_s19 + $0x408] sm:$0xff] }
  0x78   : > { %797 = vmatmul.mubr.f32.gmra.mxu0 %v341_v2  ;;  %995 = vmatmul.mubr.f32.gmra.mxu1 %v407_v3  ;;  %v373_v2 = vld [vmem:[%s1741_s19 + $0x1f0] sm:$0xff]  ;;  %v439_v3 = vld [vmem:[%s1741_s19 + $0x400] sm:$0xff] }
  0x79   : > { %1319 = vmatprep.mubr.msk.f32.mxu0 %vm443_vm0, %v344_v4  ;;  %1352 = vmatprep.mubr.msk.f32.mxu1 %vm443_vm0, %v410_v5  ;;  %v376_v4 = vld [vmem:[%s1741_s19 + $0x208] sm:$0xff]  ;;  %v442_v5 = vld [vmem:[%s1741_s19 + $0x418] sm:$0xff] }
  0x7c   : > { %803 = vmatmul.mubr.f32.gmra.mxu0 %v343_v6  ;;  %1001 = vmatmul.mubr.f32.gmra.mxu1 %v409_v7  ;;  %v375_v6 = vld [vmem:[%s1741_s19 + $0x200] sm:$0xff]  ;;  %v441_v7 = vld [vmem:[%s1741_s19 + $0x410] sm:$0xff] }
  0x7d   : > { %1320 = vmatprep.mubr.msk.f32.mxu0 %vm443_vm0, %v346_v8  ;;  %1353 = vmatprep.mubr.msk.f32.mxu1 %vm443_vm0, %v412_v9 }
  0x80   : > { %809 = vmatmul.mubr.f32.gmra.mxu0 %v345_v10  ;;  %1007 = vmatmul.mubr.f32.gmra.mxu1 %v411_v11 }
  0x81   : > { %1321 = vmatprep.mubr.msk.f32.mxu0 %vm443_vm0, %v348_v12  ;;  %1354 = vmatprep.mubr.msk.f32.mxu1 %vm443_vm0, %v414_v13 }
  0x84   : > { %815 = vmatmul.mubr.f32.gmra.mxu0 %v347_v14  ;;  %1013 = vmatmul.mubr.f32.gmra.mxu1 %v413_v15 }
  0x85   : > { %1322 = vmatprep.mubr.msk.f32.mxu0 %vm443_vm0, %v350_v16  ;;  %1355 = vmatprep.mubr.msk.f32.mxu1 %vm443_vm0, %v416_v17 }
  0x88   : > { %821 = vmatmul.mubr.f32.gmra.mxu0 %v349_v18  ;;  %1019 = vmatmul.mubr.f32.gmra.mxu1 %v415_v19 }
  0x89   : > { %1323 = vmatprep.mubr.msk.f32.mxu0 %vm443_vm0, %v352_v20  ;;  %1356 = vmatprep.mubr.msk.f32.mxu1 %vm443_vm0, %v418_v21 }
  0x8c   : > { %827 = vmatmul.mubr.f32.gmra.mxu0 %v351_v22  ;;  %1025 = vmatmul.mubr.f32.gmra.mxu1 %v417_v23 }
  0x8d   : > { %1324 = vmatprep.mubr.msk.f32.mxu0 %vm443_vm0, %v354_v24  ;;  %1357 = vmatprep.mubr.msk.f32.mxu1 %vm443_vm0, %v420_v25 }
  0x90   : > { %833 = vmatmul.mubr.f32.gmra.mxu0 %v353_v26  ;;  %1031 = vmatmul.mubr.f32.gmra.mxu1 %v419_v27 }
  0x91   : > { %1325 = vmatprep.mubr.msk.f32.mxu0 %vm443_vm0, %v356_v28  ;;  %1358 = vmatprep.mubr.msk.f32.mxu1 %vm443_vm0, %v422_v29 }
  0x94   : > { %839 = vmatmul.mubr.f32.gmra.mxu0 %v355_v30  ;;  %1037 = vmatmul.mubr.f32.gmra.mxu1 %v421_v31 }
  0x95   : > { %1326 = vmatprep.mubr.msk.f32.mxu0 %vm443_vm0, %v358_v32  ;;  %1359 = vmatprep.mubr.msk.f32.mxu1 %vm443_vm0, %v424_v33 }
  0x98   : > { %845 = vmatmul.mubr.f32.gmra.mxu0 %v357_v34  ;;  %1043 = vmatmul.mubr.f32.gmra.mxu1 %v423_v35 }
  0x99   : > { %1327 = vmatprep.mubr.msk.f32.mxu0 %vm443_vm0, %v360_v36  ;;  %1360 = vmatprep.mubr.msk.f32.mxu1 %vm443_vm0, %v426_v37 }
  0x9c   : > { %851 = vmatmul.mubr.f32.gmra.mxu0 %v359_v38  ;;  %1049 = vmatmul.mubr.f32.gmra.mxu1 %v425_v39 }
  0x9d   : > { %1328 = vmatprep.mubr.msk.f32.mxu0 %vm443_vm0, %v362_v40  ;;  %1361 = vmatprep.mubr.msk.f32.mxu1 %vm443_vm0, %v428_v41 }
  0xa0   : > { %857 = vmatmul.mubr.f32.gmra.mxu0 %v361_v42  ;;  %1055 = vmatmul.mubr.f32.gmra.mxu1 %v427_v43 }
  0xa1   : > { %1329 = vmatprep.mubr.msk.f32.mxu0 %vm443_vm0, %v364_v44  ;;  %1362 = vmatprep.mubr.msk.f32.mxu1 %vm443_vm0, %v430_v45 }
  0xa4   : > { %863 = vmatmul.mubr.f32.gmra.mxu0 %v363_v46  ;;  %1061 = vmatmul.mubr.f32.gmra.mxu1 %v429_v47 }
  0xa5   : > { %1330 = vmatprep.mubr.msk.f32.mxu0 %vm443_vm0, %v366_v48  ;;  %1363 = vmatprep.mubr.msk.f32.mxu1 %vm443_vm0, %v432_v49 }
  0xa8   : > { %869 = vmatmul.mubr.f32.gmra.mxu0 %v365_v50  ;;  %1067 = vmatmul.mubr.f32.gmra.mxu1 %v431_v51 }
  0xa9   : > { %1331 = vmatprep.mubr.msk.f32.mxu0 %vm443_vm0, %v368_v52  ;;  %1364 = vmatprep.mubr.msk.f32.mxu1 %vm443_vm0, %v434_v53 }
  0xac   : > { %875 = vmatmul.mubr.f32.gmra.mxu0 %v367_v54  ;;  %1073 = vmatmul.mubr.f32.gmra.mxu1 %v433_v55 }
  0xad   : > { %1332 = vmatprep.mubr.msk.f32.mxu0 %vm443_vm0, %v370_v56  ;;  %1365 = vmatprep.mubr.msk.f32.mxu1 %vm443_vm0, %v436_v57 }
  0xb0   : > { %881 = vmatmul.mubr.f32.gmra.mxu0 %v369_v58  ;;  %1079 = vmatmul.mubr.f32.gmra.mxu1 %v435_v59 }
  0xb1   : > { %1333 = vmatprep.mubr.msk.f32.mxu0 %vm443_vm0, %v372_v60  ;;  %1366 = vmatprep.mubr.msk.f32.mxu1 %vm443_vm0, %v438_v61 }
  0xb4   : > { %887 = vmatmul.mubr.f32.gmra.mxu0 %v371_v62  ;;  %1085 = vmatmul.mubr.f32.gmra.mxu1 %v437_v63 }
  0xb5   : > { %1334 = vmatprep.mubr.msk.f32.mxu0 %vm443_vm0, %v374_v0  ;;  %1367 = vmatprep.mubr.msk.f32.mxu1 %vm443_vm0, %v440_v1 }
  0xb8   : > { %893 = vmatmul.mubr.f32.gmra.mxu0 %v373_v2  ;;  %1091 = vmatmul.mubr.f32.gmra.mxu1 %v439_v3 }
  0xb9   : > { %1335 = vmatprep.mubr.msk.f32.mxu0 %vm443_vm0, %v376_v4  ;;  %1368 = vmatprep.mubr.msk.f32.mxu1 %vm443_vm0, %v442_v5 }
  0xbc   : > { %899 = vmatmul.mubr.f32.gmra.mxu0 %v375_v6  ;;  %1097 = vmatmul.mubr.f32.gmra.mxu1 %v441_v7 }
  0xfc   : > { %v708_v8 = vpop.f32.mrf.mxu0  ;;  %v906_v9 = vpop.f32.mrf.mxu1 }
  0xfd   : > { %1103 = vst [vmem:[%s1946_s21] sm:$0xff] %v708_v8  ;;  %1170 = vst [vmem:[%s1946_s21 + $0x210] sm:$0xff] %v906_v9 }
  0xfe   : > { %v710_v10 = vpop.f32.mrf.mxu0  ;;  %v908_v11 = vpop.f32.mrf.mxu1 }
  0xff   : > { %1105 = vst.msk [vmem:[%s1946_s21 + $0x8] sm:$0xff] %vm1104_vm1, %v710_v10  ;;  %1171 = vst.msk [vmem:[%s1946_s21 + $0x218] sm:$0xff] %vm1104_vm1, %v908_v11 }
 0x100   : > { %v714_v12 = vpop.f32.mrf.mxu0  ;;  %v912_v13 = vpop.f32.mrf.mxu1 }
 0x101   : > { %1106 = vst [vmem:[%s1946_s21 + $0x10] sm:$0xff] %v714_v12  ;;  %1172 = vst [vmem:[%s1946_s21 + $0x220] sm:$0xff] %v912_v13 }
 0x102   : > { %v716_v14 = vpop.f32.mrf.mxu0  ;;  %v914_v15 = vpop.f32.mrf.mxu1 }
 0x103   : > { %1107 = vst.msk [vmem:[%s1946_s21 + $0x18] sm:$0xff] %vm1104_vm1, %v716_v14  ;;  %1173 = vst.msk [vmem:[%s1946_s21 + $0x228] sm:$0xff] %vm1104_vm1, %v914_v15 }
 0x104   : > { %v720_v16 = vpop.f32.mrf.mxu0  ;;  %v918_v17 = vpop.f32.mrf.mxu1 }
 0x105   : > { %1108 = vst [vmem:[%s1946_s21 + $0x20] sm:$0xff] %v720_v16  ;;  %1174 = vst [vmem:[%s1946_s21 + $0x230] sm:$0xff] %v918_v17 }
 0x106   : > { %v722_v18 = vpop.f32.mrf.mxu0  ;;  %v920_v19 = vpop.f32.mrf.mxu1 }
 0x107   : > { %1109 = vst.msk [vmem:[%s1946_s21 + $0x28] sm:$0xff] %vm1104_vm1, %v722_v18  ;;  %1175 = vst.msk [vmem:[%s1946_s21 + $0x238] sm:$0xff] %vm1104_vm1, %v920_v19 }
 0x108   : > { %v726_v20 = vpop.f32.mrf.mxu0  ;;  %v924_v21 = vpop.f32.mrf.mxu1 }
 0x109   : > { %1110 = vst [vmem:[%s1946_s21 + $0x30] sm:$0xff] %v726_v20  ;;  %1176 = vst [vmem:[%s1946_s21 + $0x240] sm:$0xff] %v924_v21 }
 0x10a   : > { %v728_v22 = vpop.f32.mrf.mxu0  ;;  %v926_v23 = vpop.f32.mrf.mxu1 }
 0x10b   : > { %1111 = vst.msk [vmem:[%s1946_s21 + $0x38] sm:$0xff] %vm1104_vm1, %v728_v22  ;;  %1177 = vst.msk [vmem:[%s1946_s21 + $0x248] sm:$0xff] %vm1104_vm1, %v926_v23 }
 0x10c   : > { %v732_v24 = vpop.f32.mrf.mxu0  ;;  %v930_v25 = vpop.f32.mrf.mxu1 }
 0x10d   : > { %1112 = vst [vmem:[%s1946_s21 + $0x40] sm:$0xff] %v732_v24  ;;  %1178 = vst [vmem:[%s1946_s21 + $0x250] sm:$0xff] %v930_v25 }
 0x10e   : > { %v734_v26 = vpop.f32.mrf.mxu0  ;;  %v932_v27 = vpop.f32.mrf.mxu1 }
 0x10f   : > { %1113 = vst.msk [vmem:[%s1946_s21 + $0x48] sm:$0xff] %vm1104_vm1, %v734_v26  ;;  %1179 = vst.msk [vmem:[%s1946_s21 + $0x258] sm:$0xff] %vm1104_vm1, %v932_v27 }
 0x110   : > { %v738_v28 = vpop.f32.mrf.mxu0  ;;  %v936_v29 = vpop.f32.mrf.mxu1 }
 0x111   : > { %1114 = vst [vmem:[%s1946_s21 + $0x50] sm:$0xff] %v738_v28  ;;  %1180 = vst [vmem:[%s1946_s21 + $0x260] sm:$0xff] %v936_v29 }
 0x112   : > { %v740_v30 = vpop.f32.mrf.mxu0  ;;  %v938_v31 = vpop.f32.mrf.mxu1 }
 0x113   : > { %1115 = vst.msk [vmem:[%s1946_s21 + $0x58] sm:$0xff] %vm1104_vm1, %v740_v30  ;;  %1181 = vst.msk [vmem:[%s1946_s21 + $0x268] sm:$0xff] %vm1104_vm1, %v938_v31 }
 0x114   : > { %v744_v32 = vpop.f32.mrf.mxu0  ;;  %v942_v33 = vpop.f32.mrf.mxu1 }
 0x115   : > { %1116 = vst [vmem:[%s1946_s21 + $0x60] sm:$0xff] %v744_v32  ;;  %1182 = vst [vmem:[%s1946_s21 + $0x270] sm:$0xff] %v942_v33 }
 0x116   : > { %v746_v34 = vpop.f32.mrf.mxu0  ;;  %v944_v35 = vpop.f32.mrf.mxu1 }
 0x117   : > { %1117 = vst.msk [vmem:[%s1946_s21 + $0x68] sm:$0xff] %vm1104_vm1, %v746_v34  ;;  %1183 = vst.msk [vmem:[%s1946_s21 + $0x278] sm:$0xff] %vm1104_vm1, %v944_v35 }
 0x118   : > { %v750_v36 = vpop.f32.mrf.mxu0  ;;  %v948_v37 = vpop.f32.mrf.mxu1 }
 0x119   : > { %1118 = vst [vmem:[%s1946_s21 + $0x70] sm:$0xff] %v750_v36  ;;  %1184 = vst [vmem:[%s1946_s21 + $0x280] sm:$0xff] %v948_v37 }
 0x11a   : > { %v752_v38 = vpop.f32.mrf.mxu0  ;;  %v950_v39 = vpop.f32.mrf.mxu1 }
 0x11b   : > { %1119 = vst.msk [vmem:[%s1946_s21 + $0x78] sm:$0xff] %vm1104_vm1, %v752_v38  ;;  %1185 = vst.msk [vmem:[%s1946_s21 + $0x288] sm:$0xff] %vm1104_vm1, %v950_v39 }
 0x11c   : > { %v756_v40 = vpop.f32.mrf.mxu0  ;;  %v954_v41 = vpop.f32.mrf.mxu1 }
 0x11d   : > { %1120 = vst [vmem:[%s1946_s21 + $0x80] sm:$0xff] %v756_v40  ;;  %1186 = vst [vmem:[%s1946_s21 + $0x290] sm:$0xff] %v954_v41 }
 0x11e   : > { %v758_v42 = vpop.f32.mrf.mxu0  ;;  %v956_v43 = vpop.f32.mrf.mxu1 }
 0x11f   : > { %1121 = vst.msk [vmem:[%s1946_s21 + $0x88] sm:$0xff] %vm1104_vm1, %v758_v42  ;;  %1187 = vst.msk [vmem:[%s1946_s21 + $0x298] sm:$0xff] %vm1104_vm1, %v956_v43 }
 0x120   : > { %v762_v44 = vpop.f32.mrf.mxu0  ;;  %v960_v45 = vpop.f32.mrf.mxu1 }
 0x121   : > { %1122 = vst [vmem:[%s1946_s21 + $0x90] sm:$0xff] %v762_v44  ;;  %1188 = vst [vmem:[%s1946_s21 + $0x2a0] sm:$0xff] %v960_v45 }
 0x122   : > { %v764_v46 = vpop.f32.mrf.mxu0  ;;  %v962_v47 = vpop.f32.mrf.mxu1 }
 0x123   : > { %1123 = vst.msk [vmem:[%s1946_s21 + $0x98] sm:$0xff] %vm1104_vm1, %v764_v46  ;;  %1189 = vst.msk [vmem:[%s1946_s21 + $0x2a8] sm:$0xff] %vm1104_vm1, %v962_v47 }
 0x124   : > { %v768_v48 = vpop.f32.mrf.mxu0  ;;  %v966_v49 = vpop.f32.mrf.mxu1 }
 0x125   : > { %1124 = vst [vmem:[%s1946_s21 + $0xa0] sm:$0xff] %v768_v48  ;;  %1190 = vst [vmem:[%s1946_s21 + $0x2b0] sm:$0xff] %v966_v49 }
 0x126   : > { %v770_v50 = vpop.f32.mrf.mxu0  ;;  %v968_v51 = vpop.f32.mrf.mxu1 }
 0x127   : > { %1125 = vst.msk [vmem:[%s1946_s21 + $0xa8] sm:$0xff] %vm1104_vm1, %v770_v50  ;;  %1191 = vst.msk [vmem:[%s1946_s21 + $0x2b8] sm:$0xff] %vm1104_vm1, %v968_v51 }
 0x128   : > { %v774_v52 = vpop.f32.mrf.mxu0  ;;  %v972_v53 = vpop.f32.mrf.mxu1 }
 0x129   : > { %1126 = vst [vmem:[%s1946_s21 + $0xb0] sm:$0xff] %v774_v52  ;;  %1192 = vst [vmem:[%s1946_s21 + $0x2c0] sm:$0xff] %v972_v53 }
 0x12a   : > { %v776_v54 = vpop.f32.mrf.mxu0  ;;  %v974_v55 = vpop.f32.mrf.mxu1 }
 0x12b   : > { %1127 = vst.msk [vmem:[%s1946_s21 + $0xb8] sm:$0xff] %vm1104_vm1, %v776_v54  ;;  %1193 = vst.msk [vmem:[%s1946_s21 + $0x2c8] sm:$0xff] %vm1104_vm1, %v974_v55 }
 0x12c   : > { %v780_v56 = vpop.f32.mrf.mxu0  ;;  %v978_v57 = vpop.f32.mrf.mxu1 }
 0x12d   : > { %1128 = vst [vmem:[%s1946_s21 + $0xc0] sm:$0xff] %v780_v56  ;;  %1194 = vst [vmem:[%s1946_s21 + $0x2d0] sm:$0xff] %v978_v57 }
 0x12e   : > { %v782_v58 = vpop.f32.mrf.mxu0  ;;  %v980_v59 = vpop.f32.mrf.mxu1 }
 0x12f   : > { %1129 = vst.msk [vmem:[%s1946_s21 + $0xc8] sm:$0xff] %vm1104_vm1, %v782_v58  ;;  %1195 = vst.msk [vmem:[%s1946_s21 + $0x2d8] sm:$0xff] %vm1104_vm1, %v980_v59 }
 0x130   : > { %v786_v60 = vpop.f32.mrf.mxu0  ;;  %v984_v61 = vpop.f32.mrf.mxu1 }
 0x131   : > { %1130 = vst [vmem:[%s1946_s21 + $0xd0] sm:$0xff] %v786_v60  ;;  %1196 = vst [vmem:[%s1946_s21 + $0x2e0] sm:$0xff] %v984_v61 }
 0x132   : > { %v788_v62 = vpop.f32.mrf.mxu0  ;;  %v986_v63 = vpop.f32.mrf.mxu1 }
 0x133   : > { %1131 = vst.msk [vmem:[%s1946_s21 + $0xd8] sm:$0xff] %vm1104_vm1, %v788_v62  ;;  %1197 = vst.msk [vmem:[%s1946_s21 + $0x2e8] sm:$0xff] %vm1104_vm1, %v986_v63 }
 0x134   : > { %v792_v0 = vpop.f32.mrf.mxu0  ;;  %v990_v1 = vpop.f32.mrf.mxu1 }
 0x135   : > { %1132 = vst [vmem:[%s1946_s21 + $0xe0] sm:$0xff] %v792_v0  ;;  %1198 = vst [vmem:[%s1946_s21 + $0x2f0] sm:$0xff] %v990_v1 }
 0x136   : > { %v794_v2 = vpop.f32.mrf.mxu0  ;;  %v992_v3 = vpop.f32.mrf.mxu1 }
 0x137   : > { %1133 = vst.msk [vmem:[%s1946_s21 + $0xe8] sm:$0xff] %vm1104_vm1, %v794_v2  ;;  %1199 = vst.msk [vmem:[%s1946_s21 + $0x2f8] sm:$0xff] %vm1104_vm1, %v992_v3 }
 0x138   : > { %v798_v4 = vpop.f32.mrf.mxu0  ;;  %v996_v5 = vpop.f32.mrf.mxu1 }
 0x139   : > { %1134 = vst [vmem:[%s1946_s21 + $0xf0] sm:$0xff] %v798_v4  ;;  %1200 = vst [vmem:[%s1946_s21 + $0x300] sm:$0xff] %v996_v5 }
 0x13a   : > { %v800_v6 = vpop.f32.mrf.mxu0  ;;  %v998_v7 = vpop.f32.mrf.mxu1 }
 0x13b   : > { %1135 = vst.msk [vmem:[%s1946_s21 + $0xf8] sm:$0xff] %vm1104_vm1, %v800_v6  ;;  %1201 = vst.msk [vmem:[%s1946_s21 + $0x308] sm:$0xff] %vm1104_vm1, %v998_v7 }
 0x13c   : > { %v804_v8 = vpop.f32.mrf.mxu0  ;;  %v1002_v9 = vpop.f32.mrf.mxu1 }
 0x13d   : > { %1136 = vst [vmem:[%s1946_s21 + $0x100] sm:$0xff] %v804_v8  ;;  %1202 = vst [vmem:[%s1946_s21 + $0x310] sm:$0xff] %v1002_v9 }
 0x13e   : > { %v806_v10 = vpop.f32.mrf.mxu0  ;;  %v1004_v11 = vpop.f32.mrf.mxu1 }
 0x13f   : > { %1137 = vst.msk [vmem:[%s1946_s21 + $0x108] sm:$0xff] %vm1104_vm1, %v806_v10  ;;  %1203 = vst.msk [vmem:[%s1946_s21 + $0x318] sm:$0xff] %vm1104_vm1, %v1004_v11 }
 0x140   : > { %v810_v12 = vpop.f32.mrf.mxu0  ;;  %v1008_v13 = vpop.f32.mrf.mxu1 }
 0x141   : > { %1138 = vst [vmem:[%s1946_s21 + $0x110] sm:$0xff] %v810_v12  ;;  %1204 = vst [vmem:[%s1946_s21 + $0x320] sm:$0xff] %v1008_v13 }
 0x142   : > { %v812_v14 = vpop.f32.mrf.mxu0  ;;  %v1010_v15 = vpop.f32.mrf.mxu1 }
 0x143   : > { %1139 = vst.msk [vmem:[%s1946_s21 + $0x118] sm:$0xff] %vm1104_vm1, %v812_v14  ;;  %1205 = vst.msk [vmem:[%s1946_s21 + $0x328] sm:$0xff] %vm1104_vm1, %v1010_v15 }
 0x144   : > { %v816_v16 = vpop.f32.mrf.mxu0  ;;  %v1014_v17 = vpop.f32.mrf.mxu1 }
 0x145   : > { %1140 = vst [vmem:[%s1946_s21 + $0x120] sm:$0xff] %v816_v16  ;;  %1206 = vst [vmem:[%s1946_s21 + $0x330] sm:$0xff] %v1014_v17 }
 0x146   : > { %v818_v18 = vpop.f32.mrf.mxu0  ;;  %v1016_v19 = vpop.f32.mrf.mxu1 }
 0x147   : > { %1141 = vst.msk [vmem:[%s1946_s21 + $0x128] sm:$0xff] %vm1104_vm1, %v818_v18  ;;  %1207 = vst.msk [vmem:[%s1946_s21 + $0x338] sm:$0xff] %vm1104_vm1, %v1016_v19 }
 0x148   : > { %v822_v20 = vpop.f32.mrf.mxu0  ;;  %v1020_v21 = vpop.f32.mrf.mxu1 }
 0x149   : > { %1142 = vst [vmem:[%s1946_s21 + $0x130] sm:$0xff] %v822_v20  ;;  %1208 = vst [vmem:[%s1946_s21 + $0x340] sm:$0xff] %v1020_v21 }
 0x14a   : > { %v824_v22 = vpop.f32.mrf.mxu0  ;;  %v1022_v23 = vpop.f32.mrf.mxu1 }
 0x14b   : > { %1143 = vst.msk [vmem:[%s1946_s21 + $0x138] sm:$0xff] %vm1104_vm1, %v824_v22  ;;  %1209 = vst.msk [vmem:[%s1946_s21 + $0x348] sm:$0xff] %vm1104_vm1, %v1022_v23 }
 0x14c   : > { %v828_v24 = vpop.f32.mrf.mxu0  ;;  %v1026_v25 = vpop.f32.mrf.mxu1 }
 0x14d   : > { %1144 = vst [vmem:[%s1946_s21 + $0x140] sm:$0xff] %v828_v24  ;;  %1210 = vst [vmem:[%s1946_s21 + $0x350] sm:$0xff] %v1026_v25 }
 0x14e   : > { %v830_v26 = vpop.f32.mrf.mxu0  ;;  %v1028_v27 = vpop.f32.mrf.mxu1 }
 0x14f   : > { %1145 = vst.msk [vmem:[%s1946_s21 + $0x148] sm:$0xff] %vm1104_vm1, %v830_v26  ;;  %1211 = vst.msk [vmem:[%s1946_s21 + $0x358] sm:$0xff] %vm1104_vm1, %v1028_v27 }
 0x150   : > { %v834_v28 = vpop.f32.mrf.mxu0  ;;  %v1032_v29 = vpop.f32.mrf.mxu1 }
 0x151   : > { %1146 = vst [vmem:[%s1946_s21 + $0x150] sm:$0xff] %v834_v28  ;;  %1212 = vst [vmem:[%s1946_s21 + $0x360] sm:$0xff] %v1032_v29 }
 0x152   : > { %v836_v30 = vpop.f32.mrf.mxu0  ;;  %v1034_v31 = vpop.f32.mrf.mxu1 }
 0x153   : > { %1147 = vst.msk [vmem:[%s1946_s21 + $0x158] sm:$0xff] %vm1104_vm1, %v836_v30  ;;  %1213 = vst.msk [vmem:[%s1946_s21 + $0x368] sm:$0xff] %vm1104_vm1, %v1034_v31 }
 0x154   : > { %v840_v32 = vpop.f32.mrf.mxu0  ;;  %v1038_v33 = vpop.f32.mrf.mxu1 }
 0x155   : > { %1148 = vst [vmem:[%s1946_s21 + $0x160] sm:$0xff] %v840_v32  ;;  %1214 = vst [vmem:[%s1946_s21 + $0x370] sm:$0xff] %v1038_v33 }
 0x156   : > { %v842_v34 = vpop.f32.mrf.mxu0  ;;  %v1040_v35 = vpop.f32.mrf.mxu1 }
 0x157   : > { %1149 = vst.msk [vmem:[%s1946_s21 + $0x168] sm:$0xff] %vm1104_vm1, %v842_v34  ;;  %1215 = vst.msk [vmem:[%s1946_s21 + $0x378] sm:$0xff] %vm1104_vm1, %v1040_v35 }
 0x158   : > { %v846_v36 = vpop.f32.mrf.mxu0  ;;  %v1044_v37 = vpop.f32.mrf.mxu1 }
 0x159   : > { %1150 = vst [vmem:[%s1946_s21 + $0x170] sm:$0xff] %v846_v36  ;;  %1216 = vst [vmem:[%s1946_s21 + $0x380] sm:$0xff] %v1044_v37 }
 0x15a   : > { %v848_v38 = vpop.f32.mrf.mxu0  ;;  %v1046_v39 = vpop.f32.mrf.mxu1 }
 0x15b   : > { %1151 = vst.msk [vmem:[%s1946_s21 + $0x178] sm:$0xff] %vm1104_vm1, %v848_v38  ;;  %1217 = vst.msk [vmem:[%s1946_s21 + $0x388] sm:$0xff] %vm1104_vm1, %v1046_v39 }
 0x15c   : > { %v852_v40 = vpop.f32.mrf.mxu0  ;;  %v1050_v41 = vpop.f32.mrf.mxu1 }
 0x15d   : > { %1152 = vst [vmem:[%s1946_s21 + $0x180] sm:$0xff] %v852_v40  ;;  %1218 = vst [vmem:[%s1946_s21 + $0x390] sm:$0xff] %v1050_v41 }
 0x15e   : > { %v854_v42 = vpop.f32.mrf.mxu0  ;;  %v1052_v43 = vpop.f32.mrf.mxu1 }
 0x15f   : > { %1153 = vst.msk [vmem:[%s1946_s21 + $0x188] sm:$0xff] %vm1104_vm1, %v854_v42  ;;  %1219 = vst.msk [vmem:[%s1946_s21 + $0x398] sm:$0xff] %vm1104_vm1, %v1052_v43 }
 0x160   : > { %v858_v44 = vpop.f32.mrf.mxu0  ;;  %v1056_v45 = vpop.f32.mrf.mxu1 }
 0x161   : > { %1154 = vst [vmem:[%s1946_s21 + $0x190] sm:$0xff] %v858_v44  ;;  %1220 = vst [vmem:[%s1946_s21 + $0x3a0] sm:$0xff] %v1056_v45 }
 0x162   : > { %v860_v46 = vpop.f32.mrf.mxu0  ;;  %v1058_v47 = vpop.f32.mrf.mxu1 }
 0x163   : > { %1155 = vst.msk [vmem:[%s1946_s21 + $0x198] sm:$0xff] %vm1104_vm1, %v860_v46  ;;  %1221 = vst.msk [vmem:[%s1946_s21 + $0x3a8] sm:$0xff] %vm1104_vm1, %v1058_v47 }
 0x164   : > { %v864_v48 = vpop.f32.mrf.mxu0  ;;  %v1062_v49 = vpop.f32.mrf.mxu1 }
 0x165   : > { %1156 = vst [vmem:[%s1946_s21 + $0x1a0] sm:$0xff] %v864_v48  ;;  %1222 = vst [vmem:[%s1946_s21 + $0x3b0] sm:$0xff] %v1062_v49 }
 0x166   : > { %v866_v50 = vpop.f32.mrf.mxu0  ;;  %v1064_v51 = vpop.f32.mrf.mxu1 }
 0x167   : > { %1157 = vst.msk [vmem:[%s1946_s21 + $0x1a8] sm:$0xff] %vm1104_vm1, %v866_v50  ;;  %1223 = vst.msk [vmem:[%s1946_s21 + $0x3b8] sm:$0xff] %vm1104_vm1, %v1064_v51 }
 0x168   : > { %v870_v52 = vpop.f32.mrf.mxu0  ;;  %v1068_v53 = vpop.f32.mrf.mxu1 }
 0x169   : > { %1158 = vst [vmem:[%s1946_s21 + $0x1b0] sm:$0xff] %v870_v52  ;;  %1224 = vst [vmem:[%s1946_s21 + $0x3c0] sm:$0xff] %v1068_v53 }
 0x16a   : > { %v872_v54 = vpop.f32.mrf.mxu0  ;;  %v1070_v55 = vpop.f32.mrf.mxu1 }
 0x16b   : > { %1159 = vst.msk [vmem:[%s1946_s21 + $0x1b8] sm:$0xff] %vm1104_vm1, %v872_v54  ;;  %1225 = vst.msk [vmem:[%s1946_s21 + $0x3c8] sm:$0xff] %vm1104_vm1, %v1070_v55 }
 0x16c   : > { %v876_v56 = vpop.f32.mrf.mxu0  ;;  %v1074_v57 = vpop.f32.mrf.mxu1 }
 0x16d   : > { %1160 = vst [vmem:[%s1946_s21 + $0x1c0] sm:$0xff] %v876_v56  ;;  %1226 = vst [vmem:[%s1946_s21 + $0x3d0] sm:$0xff] %v1074_v57 }
 0x16e   : > { %v878_v58 = vpop.f32.mrf.mxu0  ;;  %v1076_v59 = vpop.f32.mrf.mxu1 }
 0x16f   : > { %1161 = vst.msk [vmem:[%s1946_s21 + $0x1c8] sm:$0xff] %vm1104_vm1, %v878_v58  ;;  %1227 = vst.msk [vmem:[%s1946_s21 + $0x3d8] sm:$0xff] %vm1104_vm1, %v1076_v59 }
 0x170   : > { %v882_v60 = vpop.f32.mrf.mxu0  ;;  %v1080_v61 = vpop.f32.mrf.mxu1 }
 0x171   : > { %1162 = vst [vmem:[%s1946_s21 + $0x1d0] sm:$0xff] %v882_v60  ;;  %1228 = vst [vmem:[%s1946_s21 + $0x3e0] sm:$0xff] %v1080_v61 }
 0x172   : > { %v884_v62 = vpop.f32.mrf.mxu0  ;;  %v1082_v63 = vpop.f32.mrf.mxu1 }
 0x173   : > { %1163 = vst.msk [vmem:[%s1946_s21 + $0x1d8] sm:$0xff] %vm1104_vm1, %v884_v62  ;;  %1229 = vst.msk [vmem:[%s1946_s21 + $0x3e8] sm:$0xff] %vm1104_vm1, %v1082_v63 }
 0x174   : > { %v888_v0 = vpop.f32.mrf.mxu0  ;;  %v1086_v1 = vpop.f32.mrf.mxu1 }
 0x175   : > { %1164 = vst [vmem:[%s1946_s21 + $0x1e0] sm:$0xff] %v888_v0  ;;  %1230 = vst [vmem:[%s1946_s21 + $0x3f0] sm:$0xff] %v1086_v1 }
 0x176   : > { %v890_v2 = vpop.f32.mrf.mxu0  ;;  %v1088_v3 = vpop.f32.mrf.mxu1 }
 0x177   : > { %1165 = vst.msk [vmem:[%s1946_s21 + $0x1e8] sm:$0xff] %vm1104_vm1, %v890_v2  ;;  %1231 = vst.msk [vmem:[%s1946_s21 + $0x3f8] sm:$0xff] %vm1104_vm1, %v1088_v3 }
 0x178   : > { %v894_v4 = vpop.f32.mrf.mxu0  ;;  %v1092_v5 = vpop.f32.mrf.mxu1 }
 0x179   : > { %1166 = vst [vmem:[%s1946_s21 + $0x1f0] sm:$0xff] %v894_v4  ;;  %1232 = vst [vmem:[%s1946_s21 + $0x400] sm:$0xff] %v1092_v5 }
 0x17a   : > { %v896_v6 = vpop.f32.mrf.mxu0  ;;  %v1094_v7 = vpop.f32.mrf.mxu1 }
 0x17b   : > { %1167 = vst.msk [vmem:[%s1946_s21 + $0x1f8] sm:$0xff] %vm1104_vm1, %v896_v6  ;;  %1233 = vst.msk [vmem:[%s1946_s21 + $0x408] sm:$0xff] %vm1104_vm1, %v1094_v7 }
 0x17c   : > { %v900_v8 = vpop.f32.mrf.mxu0  ;;  %v1098_v9 = vpop.f32.mrf.mxu1 }
 0x17d   : > { %1168 = vst [vmem:[%s1946_s21 + $0x200] sm:$0xff] %v900_v8  ;;  %1234 = vst [vmem:[%s1946_s21 + $0x410] sm:$0xff] %v1098_v9 }
 0x17e   : > { %v902_v10 = vpop.f32.mrf.mxu0  ;;  %v1100_v11 = vpop.f32.mrf.mxu1 }
 0x17f   : > { %1169 = vst.msk [vmem:[%s1946_s21 + $0x208] sm:$0xff] %vm1104_vm1, %v902_v10  ;;  %1235 = vst.msk [vmem:[%s1946_s21 + $0x418] sm:$0xff] %vm1104_vm1, %v1100_v11 }
 0x180 PF: > { %s13_s12 = sadd.s32 1, %s1431_s12  }
 0x181   : > { %p10_p4 = scmp.ge.s32.totalorder %s13_s12, 4  }
 0x183   :  { %12 = sbr.rel (!%p10_p4) target bundleno = 1 (0x1), region = 62 }

</bundles_post_ra>
